<compile_context>
chip_gen: v5e
topology: v5e:2x2
jax: 0.10.0
libtpu: 0.0.40
codegen_flags: <defaults>
</compile_context>

<pallas_src>
import functools

import jax
import jax.numpy as jnp
from jax import lax
from jax.experimental import pallas as pl
from jax.experimental.pallas import tpu as pltpu

LN_EPS = 1e-6
_SQRT_2_OVER_PI = 0.7978845608028654
_GELU_C = 0.044715
_INV_SQRT2 = 0.7071067811865476


def _round_up(a, b):
    return (a + b - 1) // b * b


def _im2col_bf16(x):
    """x: (N, Cin, H, W) f32 -> bf16 patches (M, 9*Cin) for conv 3x3 / stride 2 / pad 1."""
    N, Cin, H, W = x.shape
    Ho = (H + 2 - 3) // 2 + 1
    Wo = (W + 2 - 3) // 2 + 1
    xh = jnp.transpose(x, (0, 2, 3, 1)).astype(jnp.bfloat16)          # NHWC, bf16
    xp = jnp.pad(xh, ((0, 0), (1, 1), (1, 1), (0, 0)))
    taps = []
    for kh in range(3):
        for kw in range(3):
            taps.append(xp[:, kh:kh + 2 * Ho - 1:2, kw:kw + 2 * Wo - 1:2, :])
    patches = jnp.stack(taps, axis=3)                                 # (N, Ho, Wo, 9, Cin)
    return patches.reshape(N * Ho * Wo, 9 * Cin), (N, Ho, Wo)


def stem_kernel(pg_ref, w1_ref, w2_ref, pool_ref, vec_ref, o_ref):
    bf16 = jnp.bfloat16
    pool = pool_ref[...]                                              # (Cg, Cg) bf16

    # conv1 (3x3 stride-2) over the grouped im2col tile: bf16 x bf16 -> f32 accum
    h = jnp.dot(pg_ref[...], w1_ref[...], preferred_element_type=jnp.float32)
    h = h + vec_ref[0:1, :]                                           # + b1 (f32)

    # norm1: per-pixel LayerNorm; group mean/var via MXU pooling matmuls
    # (the MXU has slack here; replaces masked XLU lane reductions).
    mu = jnp.dot(h.astype(bf16), pool, preferred_element_type=jnp.float32)
    xc = h - mu                                                       # cancellation kept in f32
    xcb = xc.astype(bf16)
    var = jnp.dot(xcb * xcb, pool, preferred_element_type=jnp.float32)
    inv = lax.rsqrt(var + LN_EPS)                                     # f32, EUP
    scale1 = (inv * vec_ref[1:2, :]).astype(bf16)                     # rsqrt * gamma1 in f32, then cast
    hb = xcb * scale1 + vec_ref[2:3, :].astype(bf16)

    # act: GELU, tanh approximation (tanh -> EUP instead of erf VALU polynomial)
    u = hb + _GELU_C * (hb * hb * hb)
    hb = 0.5 * hb * (1.0 + jnp.tanh(_SQRT_2_OVER_PI * u))

    # conv2 (1x1): block-diagonal bf16 channel matmul, f32 accumulation
    h2 = jnp.dot(hb, w2_ref[...], preferred_element_type=jnp.float32)
    h2 = h2 + vec_ref[3:4, :]                                         # + b2

    # norm2 (output stays channels_last inside each lane group)
    mu2 = jnp.dot(h2.astype(bf16), pool, preferred_element_type=jnp.float32)
    xc2 = h2 - mu2
    xc2b = xc2.astype(bf16)
    var2 = jnp.dot(xc2b * xc2b, pool, preferred_element_type=jnp.float32)
    inv2 = lax.rsqrt(var2 + LN_EPS)
    scale2 = (inv2 * vec_ref[4:5, :]).astype(bf16)
    o = xc2b * scale2 + vec_ref[5:6, :].astype(bf16)

    o_ref[...] = o.astype(o_ref.dtype)


@functools.partial(jax.jit, static_argnames=("tm", "out_dtype"))
def stem_layer(x, params, tm=4096, out_dtype=jnp.bfloat16):
    """x: (N, Cin, H, W) f32 (NCHW, like PyTorch). Returns (N, Ho, Wo, Cout) in out_dtype."""
    w1, b1, g1, be1, w2, b2, g2, be2 = params
    Cout = w1.shape[0]

    patches, (N, Ho, Wo) = _im2col_bf16(x)
    M, K1 = patches.shape

    # G output pixels share one 128-lane row -> fully lane-dense compute & stores.
    G = 128 // Cout if (Cout <= 128 and 128 % Cout == 0) else 1
    Kg, Cg = G * K1, G * Cout

    # conv1 weight (Cout, Cin, 3, 3) -> (9*Cin, Cout); conv2 (Cout, Cout, 1, 1) -> (Cin_idx, Cout_idx)
    w1r = jnp.transpose(w1, (2, 3, 1, 0)).reshape(K1, Cout)
    w2r = jnp.transpose(w2.reshape(Cout, Cout), (1, 0))
    eye_g = jnp.eye(G, dtype=jnp.float32)
    w1g = jnp.kron(eye_g, w1r).astype(jnp.bfloat16)                   # (Kg, Cg) block-diag
    w2g = jnp.kron(eye_g, w2r).astype(jnp.bfloat16)                   # (Cg, Cg) block-diag
    # group-pooling matrix: mean over each pixel's Cout channels, broadcast to its group
    pool = jnp.kron(eye_g, jnp.full((Cout, Cout), 1.0 / Cout, jnp.float32)).astype(jnp.bfloat16)
    vecs = jnp.stack([jnp.tile(v.astype(jnp.float32), G)
                      for v in (b1, g1, be1, b2, g2, be2)], axis=0)   # (6, Cg) f32

    # Row tile: big enough to amortize the ~0.35us/step overhead, clamped so the
    # grid has >= 2 steps (v7x megacore sharding via "parallel").
    align = max(8, G)
    tm_eff = max(align, min(tm, _round_up(pl.cdiv(M, 2), align)))
    Mp = _round_up(M, tm_eff)
    if Mp != M:
        patches = jnp.pad(patches, ((0, Mp - M), (0, 0)))
    patches_g = patches.reshape(Mp // G, Kg)                          # free row-major refold
    tm_g = tm_eff // G

    full = lambda *shape: pl.BlockSpec(shape, lambda i: (0,) * len(shape))

    out = pl.pallas_call(
        stem_kernel,
        out_shape=jax.ShapeDtypeStruct((Mp // G, Cg), out_dtype),
        grid_spec=pltpu.PrefetchScalarGridSpec(
            num_scalar_prefetch=0,
            grid=(Mp // tm_eff,),
            in_specs=[
                pl.BlockSpec((tm_g, Kg), lambda i: (i, 0)),           # grouped bf16 patches
                full(Kg, Cg),                                         # conv1 weight (block-diag)
                full(Cg, Cg),                                         # conv2 weight (block-diag)
                full(Cg, Cg),                                         # LN group-pooling matrix
                full(6, Cg),                                          # b1,g1,be1,b2,g2,be2 (tiled)
            ],
            out_specs=pl.BlockSpec((tm_g, Cg), lambda i: (i, 0)),
        ),
        compiler_params=pltpu.CompilerParams(dimension_semantics=("parallel",)),
    )(patches_g, w1g, w2g, pool, vecs)

    out = out.reshape(Mp, Cout)[:M]                                   # free reshape + slice
    return out.reshape(N, Ho, Wo, Cout)


def _ln_ref(h, gamma, beta):
    mu = jnp.mean(h, axis=-1, keepdims=True)
    var = jnp.mean(jnp.square(h - mu), axis=-1, keepdims=True)
    return (h - mu) * lax.rsqrt(var + LN_EPS) * gamma + beta


def stem_reference(x, params):
    """Exact f32 reference of the PyTorch StemLayer (erf GELU); channels_last output."""
    w1, b1, g1, be1, w2, b2, g2, be2 = params
    Cout = w1.shape[0]
    h = lax.conv_general_dilated(x, w1, window_strides=(2, 2), padding=((1, 1), (1, 1)),
                                 dimension_numbers=("NCHW", "OIHW", "NCHW"))
    h = jnp.transpose(h, (0, 2, 3, 1)) + b1                           # NHWC
    h = _ln_ref(h, g1, be1)
    h = 0.5 * h * (1.0 + lax.erf(h * _INV_SQRT2))                     # exact GELU (nn.GELU default)
    h = jnp.dot(h, jnp.transpose(w2.reshape(Cout, Cout), (1, 0))) + b2
    h = _ln_ref(h, g2, be2)
    return h


def init_params(key, in_channels, out_channels):
    k = jax.random.split(key, 4)
    w1 = jax.random.normal(k[0], (out_channels, in_channels, 3, 3),
                           jnp.float32) / jnp.sqrt(in_channels * 9.0)
    b1 = jax.random.normal(k[1], (out_channels,), jnp.float32) * 0.01
    w2 = jax.random.normal(k[2], (out_channels, out_channels, 1, 1),
                           jnp.float32) / jnp.sqrt(float(out_channels))
    b2 = jax.random.normal(k[3], (out_channels,), jnp.float32) * 0.01
    g1 = jnp.ones((out_channels,), jnp.float32)
    be1 = jnp.zeros((out_channels,), jnp.float32)
    g2 = jnp.ones((out_channels,), jnp.float32)
    be2 = jnp.zeros((out_channels,), jnp.float32)
    return (w1, b1, g1, be1, w2, b2, g2, be2)


if __name__ == "__main__":
    key = jax.random.PRNGKey(0)
    kx, kp = jax.random.split(key)

    N, Cin, H, W = 2, 4, 16, 16
    Cout = 32

    x = jax.random.normal(kx, (N, Cin, H, W), jnp.float32)
    params = init_params(kp, Cin, Cout)

    y = jax.block_until_ready(stem_layer(x, params))
    assert y.shape == (N, H // 2, W // 2, Cout), y.shape

    y32 = y.astype(jnp.float32)
    assert bool(jnp.all(jnp.isfinite(y32)))

    # Tolerance covers the intentional numerics deviations vs the exact-f32 /
    # exact-erf PyTorch path: bf16 patches & matmuls, bf16 LN/GELU elementwise,
    # tanh-approx GELU, bf16 output.
    y_ref = jax.block_until_ready(stem_reference(x, params))
    err = jnp.abs(y32 - y_ref)
    rel = err / jnp.maximum(jnp.abs(y_ref), 1.0)
    assert float(jnp.max(rel)) < 5e-2, float(jnp.max(rel))
    assert float(jnp.mean(err)) < 5e-3, float(jnp.mean(err))

    print("KERNEL_OK")
</pallas_src>

<mosaic_0001>
module attributes {stable_mosaic.version = 11 : i64} {
  func.func @stem_kernel(%arg0: i32, %arg1: memref<16x144xbf16, #tpu.memory_space<vmem>>, %arg2: memref<144x128xbf16, #tpu.memory_space<vmem>>, %arg3: memref<128x128xbf16, #tpu.memory_space<vmem>>, %arg4: memref<128x128xbf16, #tpu.memory_space<vmem>>, %arg5: memref<6x128xf32, #tpu.memory_space<vmem>>, %arg6: memref<16x128xbf16, #tpu.memory_space<vmem>>) attributes {dimension_semantics = [#tpu.dimension_semantics<parallel>], iteration_bounds = array<i64: 2>, scalar_prefetch = 0 : i64, scratch_operands = 0 : i64, tpu.core_type = #tpu.core_type<tc>, window_params = [{transform_indices = @transform_0, window_bounds = array<i64: 16, 144>}, {pipeline_mode = #tpu.pipeline_mode<synchronous>, transform_indices = @transform_1, window_bounds = array<i64: 144, 128>}, {pipeline_mode = #tpu.pipeline_mode<synchronous>, transform_indices = @transform_2, window_bounds = array<i64: 128, 128>}, {pipeline_mode = #tpu.pipeline_mode<synchronous>, transform_indices = @transform_3, window_bounds = array<i64: 128, 128>}, {pipeline_mode = #tpu.pipeline_mode<synchronous>, transform_indices = @transform_4, window_bounds = array<i64: 6, 128>}, {transform_indices = @transform_5, window_bounds = array<i64: 16, 128>}]} {
    %c0 = arith.constant 0 : index
    %c0_0 = arith.constant 0 : index
    %0 = vector.load %arg4[%c0, %c0_0] : memref<128x128xbf16, #tpu.memory_space<vmem>>, vector<128x128xbf16>
    %c0_1 = arith.constant 0 : index
    %c0_2 = arith.constant 0 : index
    %1 = vector.load %arg1[%c0_1, %c0_2] : memref<16x144xbf16, #tpu.memory_space<vmem>>, vector<16x144xbf16>
    %c0_3 = arith.constant 0 : index
    %c0_4 = arith.constant 0 : index
    %2 = vector.load %arg2[%c0_3, %c0_4] : memref<144x128xbf16, #tpu.memory_space<vmem>>, vector<144x128xbf16>
    %cst = arith.constant dense<0.000000e+00> : vector<16x128xf32>
    %3 = tpu.matmul %1, %2, %cst {dimension_numbers = #tpu.dot_dimension_numbers<[1], [0], [0], [1], [0, 0, 1, 1], [], []>} : vector<16x144xbf16>, vector<144x128xbf16>, vector<16x128xf32> -> vector<16x128xf32>
    %c0_5 = arith.constant 0 : index
    %c0_6 = arith.constant 0 : index
    %4 = vector.load %arg5[%c0_5, %c0_6] : memref<6x128xf32, #tpu.memory_space<vmem>>, vector<1x128xf32>
    %5 = vector.broadcast %4 : vector<1x128xf32> to vector<16x128xf32>
    %6 = arith.addf %3, %5 : vector<16x128xf32>
    %7 = arith.truncf %6 : vector<16x128xf32> to vector<16x128xbf16>
    %cst_7 = arith.constant dense<0.000000e+00> : vector<16x128xf32>
    %8 = tpu.matmul %7, %0, %cst_7 {dimension_numbers = #tpu.dot_dimension_numbers<[1], [0], [0], [1], [0, 0, 1, 1], [], []>} : vector<16x128xbf16>, vector<128x128xbf16>, vector<16x128xf32> -> vector<16x128xf32>
    %9 = arith.subf %6, %8 : vector<16x128xf32>
    %10 = arith.truncf %9 : vector<16x128xf32> to vector<16x128xbf16>
    %11 = arith.mulf %10, %10 : vector<16x128xbf16>
    %cst_8 = arith.constant dense<0.000000e+00> : vector<16x128xf32>
    %12 = tpu.matmul %11, %0, %cst_8 {dimension_numbers = #tpu.dot_dimension_numbers<[1], [0], [0], [1], [0, 0, 1, 1], [], []>} : vector<16x128xbf16>, vector<128x128xbf16>, vector<16x128xf32> -> vector<16x128xf32>
    %cst_9 = arith.constant 9.99999997E-7 : f32
    %13 = vector.broadcast %cst_9 : f32 to vector<16x128xf32>
    %14 = arith.addf %12, %13 : vector<16x128xf32>
    %15 = math.rsqrt %14 : vector<16x128xf32>
    %c1 = arith.constant 1 : index
    %c0_10 = arith.constant 0 : index
    %16 = vector.load %arg5[%c1, %c0_10] : memref<6x128xf32, #tpu.memory_space<vmem>>, vector<1x128xf32>
    %17 = vector.broadcast %16 : vector<1x128xf32> to vector<16x128xf32>
    %18 = arith.mulf %15, %17 : vector<16x128xf32>
    %19 = arith.truncf %18 : vector<16x128xf32> to vector<16x128xbf16>
    %20 = arith.mulf %10, %19 : vector<16x128xbf16>
    %c2 = arith.constant 2 : index
    %c0_11 = arith.constant 0 : index
    %21 = vector.load %arg5[%c2, %c0_11] : memref<6x128xf32, #tpu.memory_space<vmem>>, vector<1x128xf32>
    %22 = arith.truncf %21 : vector<1x128xf32> to vector<1x128xbf16>
    %23 = vector.broadcast %22 : vector<1x128xbf16> to vector<16x128xbf16>
    %24 = arith.addf %20, %23 : vector<16x128xbf16>
    %25 = arith.mulf %24, %24 : vector<16x128xbf16>
    %26 = arith.mulf %25, %24 : vector<16x128xbf16>
    %cst_12 = arith.constant 4.467770e-02 : bf16
    %27 = vector.broadcast %cst_12 : bf16 to vector<16x128xbf16>
    %28 = arith.mulf %27, %26 : vector<16x128xbf16>
    %29 = arith.addf %24, %28 : vector<16x128xbf16>
    %cst_13 = arith.constant 5.000000e-01 : bf16
    %30 = vector.broadcast %cst_13 : bf16 to vector<16x128xbf16>
    %31 = arith.mulf %30, %24 : vector<16x128xbf16>
    %cst_14 = arith.constant 7.968750e-01 : bf16
    %32 = vector.broadcast %cst_14 : bf16 to vector<16x128xbf16>
    %33 = arith.mulf %32, %29 : vector<16x128xbf16>
    %34 = math.tanh %33 : vector<16x128xbf16>
    %cst_15 = arith.constant 1.000000e+00 : bf16
    %35 = vector.broadcast %cst_15 : bf16 to vector<16x128xbf16>
    %36 = arith.addf %35, %34 : vector<16x128xbf16>
    %37 = arith.mulf %31, %36 : vector<16x128xbf16>
    %c0_16 = arith.constant 0 : index
    %c0_17 = arith.constant 0 : index
    %38 = vector.load %arg3[%c0_16, %c0_17] : memref<128x128xbf16, #tpu.memory_space<vmem>>, vector<128x128xbf16>
    %cst_18 = arith.constant dense<0.000000e+00> : vector<16x128xf32>
    %39 = tpu.matmul %37, %38, %cst_18 {dimension_numbers = #tpu.dot_dimension_numbers<[1], [0], [0], [1], [0, 0, 1, 1], [], []>} : vector<16x128xbf16>, vector<128x128xbf16>, vector<16x128xf32> -> vector<16x128xf32>
    %c3 = arith.constant 3 : index
    %c0_19 = arith.constant 0 : index
    %40 = vector.load %arg5[%c3, %c0_19] : memref<6x128xf32, #tpu.memory_space<vmem>>, vector<1x128xf32>
    %41 = vector.broadcast %40 : vector<1x128xf32> to vector<16x128xf32>
    %42 = arith.addf %39, %41 : vector<16x128xf32>
    %43 = arith.truncf %42 : vector<16x128xf32> to vector<16x128xbf16>
    %cst_20 = arith.constant dense<0.000000e+00> : vector<16x128xf32>
    %44 = tpu.matmul %43, %0, %cst_20 {dimension_numbers = #tpu.dot_dimension_numbers<[1], [0], [0], [1], [0, 0, 1, 1], [], []>} : vector<16x128xbf16>, vector<128x128xbf16>, vector<16x128xf32> -> vector<16x128xf32>
    %45 = arith.subf %42, %44 : vector<16x128xf32>
    %46 = arith.truncf %45 : vector<16x128xf32> to vector<16x128xbf16>
    %47 = arith.mulf %46, %46 : vector<16x128xbf16>
    %cst_21 = arith.constant dense<0.000000e+00> : vector<16x128xf32>
    %48 = tpu.matmul %47, %0, %cst_21 {dimension_numbers = #tpu.dot_dimension_numbers<[1], [0], [0], [1], [0, 0, 1, 1], [], []>} : vector<16x128xbf16>, vector<128x128xbf16>, vector<16x128xf32> -> vector<16x128xf32>
    %cst_22 = arith.constant 9.99999997E-7 : f32
    %49 = vector.broadcast %cst_22 : f32 to vector<16x128xf32>
    %50 = arith.addf %48, %49 : vector<16x128xf32>
    %51 = math.rsqrt %50 : vector<16x128xf32>
    %c4 = arith.constant 4 : index
    %c0_23 = arith.constant 0 : index
    %52 = vector.load %arg5[%c4, %c0_23] : memref<6x128xf32, #tpu.memory_space<vmem>>, vector<1x128xf32>
    %53 = vector.broadcast %52 : vector<1x128xf32> to vector<16x128xf32>
    %54 = arith.mulf %51, %53 : vector<16x128xf32>
    %55 = arith.truncf %54 : vector<16x128xf32> to vector<16x128xbf16>
    %56 = arith.mulf %46, %55 : vector<16x128xbf16>
    %c5 = arith.constant 5 : index
    %c0_24 = arith.constant 0 : index
    %57 = vector.load %arg5[%c5, %c0_24] : memref<6x128xf32, #tpu.memory_space<vmem>>, vector<1x128xf32>
    %58 = arith.truncf %57 : vector<1x128xf32> to vector<1x128xbf16>
    %59 = vector.broadcast %58 : vector<1x128xbf16> to vector<16x128xbf16>
    %60 = arith.addf %56, %59 : vector<16x128xbf16>
    %c0_25 = arith.constant 0 : index
    %c0_26 = arith.constant 0 : index
    %61 = vector.load %arg6[%c0_25, %c0_26] : memref<16x128xbf16, #tpu.memory_space<vmem>>, vector<16x128xbf16>
    tpu.vector_store %arg6[%c0_25, %c0_26], %60 {strides = array<i32>} : memref<16x128xbf16, #tpu.memory_space<vmem>>, vector<16x128xbf16>,
    return
  }
  func.func @transform_0(%arg0: i32) -> (i32, i32) {
    %c0_i32 = arith.constant 0 : i32
    %c0_i32_0 = arith.constant 0 : i32
    return %arg0, %c0_i32 : i32, i32
  }
  func.func @transform_1(%arg0: i32) -> (i32, i32) {
    %c0_i32 = arith.constant 0 : i32
    %c0_i32_0 = arith.constant 0 : i32
    %c0_i32_1 = arith.constant 0 : i32
    return %c0_i32, %c0_i32_0 : i32, i32
  }
  func.func @transform_2(%arg0: i32) -> (i32, i32) {
    %c0_i32 = arith.constant 0 : i32
    %c0_i32_0 = arith.constant 0 : i32
    %c0_i32_1 = arith.constant 0 : i32
    return %c0_i32, %c0_i32_0 : i32, i32
  }
  func.func @transform_3(%arg0: i32) -> (i32, i32) {
    %c0_i32 = arith.constant 0 : i32
    %c0_i32_0 = arith.constant 0 : i32
    %c0_i32_1 = arith.constant 0 : i32
    return %c0_i32, %c0_i32_0 : i32, i32
  }
  func.func @transform_4(%arg0: i32) -> (i32, i32) {
    %c0_i32 = arith.constant 0 : i32
    %c0_i32_0 = arith.constant 0 : i32
    %c0_i32_1 = arith.constant 0 : i32
    return %c0_i32, %c0_i32_0 : i32, i32
  }
  func.func @transform_5(%arg0: i32) -> (i32, i32) {
    %c0_i32 = arith.constant 0 : i32
    %c0_i32_0 = arith.constant 0 : i32
    return %arg0, %c0_i32 : i32, i32
  }
}

</mosaic_0001>

<bundles_post_ra>
// kernel: mul.4
= control target key start
LH: loop header
LB: loop body
LE: loop exit
PB: predicated region body
PF: predicated region fallthrough
CT: control target
= control target key end

     0   :  { %vm39_vm0 = vcmask 261120   ;;  %s170_s0 = inlined_call_operand.vmem [shape: f32[3,3,4,32], index: 0, kind: input, shape index: {}]   ;;  %s171_s1 = inlined_call_operand.vmem [shape: f32[36,32], index: 1, kind: output, shape index: {}]  }
   0x1   :  { %v81_v0 = vld [vmem:[%s170_s0 + $0x20] sm:$0xf]  ;;  %v82_v1 = vld [vmem:[%s170_s0 + $0x1c] sm:$0xf]  ;;  %v83_v2 = vld [vmem:[%s170_s0 + $0x18] sm:$0xf] }
   0x2   :  { %7 = vst [vmem:[#allocation0 + $0x10] sm:$0xf] %v81_v0  ;;  %v84_v3 = vld [vmem:[%s170_s0 + $0x14] sm:$0xf]  ;;  %v85_v4 = vld [vmem:[%s170_s0 + $0x10] sm:$0xf] }
   0x3   :  { %11 = vst [vmem:[#allocation0 + $0x40] sm:$0xf] %v82_v1  ;;  %v86_v5 = vld [vmem:[%s170_s0 + $0xc] sm:$0xf]  ;;  %v87_v6 = vld [vmem:[%s170_s0 + $0x8] sm:$0xf] }
   0x4   :  { %15 = vst [vmem:[#allocation0 + $0x28] sm:$0xf] %v83_v2  ;;  %v88_v7 = vld [vmem:[%s170_s0 + $0x4] sm:$0xf]  ;;  %v36_v8 = vld [vmem:[%s170_s0] sm:$0xf] }
   0x5   :  { %19 = vst [vmem:[#allocation0 + $0x30] sm:$0xf] %v84_v3 }
   0x6   :  { %23 = vst [vmem:[#allocation0 + $0x20] sm:$0xf] %v85_v4 }
   0x7   :  { %27 = vst [vmem:[#allocation0 + $0x18] sm:$0xf] %v86_v5 }
   0x8   :  { %31 = vst [vmem:[#allocation0] sm:$0xf] %v87_v6 }
   0x9   :  { %35 = vst [vmem:[#allocation0 + $0x8] sm:$0xf] %v88_v7  ;;  %v77_v16 = vld [vmem:[#allocation0 + $0x10] sm:$0xf]  }
   0xa   :  { %37 = vst [vmem:[#allocation0 + $0x38] sm:$0xf] %v36_v8  ;;  %v72_v9 = vld [vmem:[#allocation0 + $0x40] sm:$0xf]  }
   0xb   :  { %v67_v10 = vld [vmem:[#allocation0 + $0x28] sm:$0xf]   ;;  %95 = vst.msk [vmem:[%s171_s1 + $0x1c] sm:$0xf] %vm39_vm0, %v72_v9  }
   0xc   :  { %v62_v11 = vld [vmem:[#allocation0 + $0x30] sm:$0xf]   ;;  %94 = vst.msk [vmem:[%s171_s1 + $0x18] sm:$0xf] %vm39_vm0, %v67_v10  }
   0xd   :  { %v57_v12 = vld [vmem:[#allocation0 + $0x20] sm:$0xf]   ;;  %93 = vst.msk [vmem:[%s171_s1 + $0x14] sm:$0xf] %vm39_vm0, %v62_v11  }
   0xe   :  { %v52_v13 = vld [vmem:[#allocation0 + $0x18] sm:$0xf]   ;;  %92 = vst.msk [vmem:[%s171_s1 + $0x10] sm:$0xf] %vm39_vm0, %v57_v12  }
   0xf   :  { %v47_v14 = vld [vmem:[#allocation0] sm:$0xf]   ;;  %91 = vst.msk [vmem:[%s171_s1 + $0xc] sm:$0xf] %vm39_vm0, %v52_v13  }
  0x10   :  { %v42_v15 = vld [vmem:[#allocation0 + $0x8] sm:$0xf]   ;;  %90 = vst.msk [vmem:[%s171_s1 + $0x8] sm:$0xf] %vm39_vm0, %v47_v14  }
  0x11   :  { %v38_v17 = vld [vmem:[#allocation0 + $0x38] sm:$0xf]   ;;  %89 = vst.msk [vmem:[%s171_s1 + $0x4] sm:$0xf] %vm39_vm0, %v42_v15  }
  0x12   :  { %40 = vst.msk [vmem:[%s171_s1] sm:$0xf] %vm39_vm0, %v38_v17  }
  0x13   :  { %96 = vst.msk [vmem:[%s171_s1 + $0x20] sm:$0xf] %vm39_vm0, %v77_v16  }

// kernel: tile.33
= control target key start
LH: loop header
LB: loop body
LE: loop exit
PB: predicated region body
PF: predicated region fallthrough
CT: control target
= control target key end

     0   :  { %s22_s0 = inlined_call_operand.vmem [shape: f32[32], index: 0, kind: input, shape index: {}]   ;;  %s23_s1 = inlined_call_operand.vmem [shape: f32[4,32], index: 1, kind: output, shape index: {}]  }
   0x1   :  { %v4_v0 = vld [vmem:[%s22_s0] ss:$0 sm:$0xff] }
   0x2   :  { %5 = vst [vmem:[%s23_s1] sm:$0xf] %v4_v0 }

// kernel: tile.54
= control target key start
LH: loop header
LB: loop body
LE: loop exit
PB: predicated region body
PF: predicated region fallthrough
CT: control target
= control target key end

     0   :  { %s37_s8 = smov 32   ;;  %s38_s9 = smov 64   ;;  %vm7_vm0 = vcmask 261120   ;;  %vm13_vm1 = vcmask 1048320   ;;  %vm19_vm2 = vcmask 785920   ;;  %vm25_vm3 = vcmask 523520   ;;  %s55_s0 = inlined_call_operand.vmem [shape: f32[4,32], index: 0, kind: input, shape index: {}]   ;;  %s56_s1 = inlined_call_operand.vmem [shape: f32[1,128], index: 1, kind: output, shape index: {}]  }
   0x1   :  { %v4_v0 = vld [vmem:[%s55_s0] sm:$0xf]  ;;  %s36_s0 = smov 96  }
   0x2   :  { %5 = vst [vmem:[#allocation1] sm:$0xf] %v4_v0 }
   0x9   :  { %v10_v1 = vld [vmem:[#allocation1 + $0x3] sm:$0x1]   ;;  %v22_v2 = vld [vmem:[#allocation1 + $0x1] sm:$0x1]   ;;  %v16_v3 = vld [vmem:[#allocation1 + $0x2] sm:$0x1]  }
   0xa   :  { %11 = vrot.lane.b32.xlu0 %v10_v1, %s36_s0  ;;  %23 = vrot.lane.b32.xlu1 %v22_v2, %s37_s8  ;;  %v6_v4 = vld [vmem:[#allocation1] sm:$0x1]  }
   0xb   :  { %8 = vst.msk [vmem:[#allocation0] sm:$0x1] %vm7_vm0, %v6_v4  }
  0x12   :  { %17 = vrot.lane.b32.xlu0 %v16_v3, %s38_s9 }
  0x7c   :  { %v12_v5 = vpop.permute.xlu0 %11   ;;  %v24_v6 = vpop.permute.xlu1 %23  }
  0x7d   :  { %14 = vst.msk [vmem:[#allocation0] sm:$0x1] %vm13_vm1, %v12_v5  }
  0x84   :  { %v18_v7 = vpop.permute.xlu0 %17  }
  0x85   :  { %20 = vst.msk [vmem:[#allocation0] sm:$0x1] %vm19_vm2, %v18_v7  }
  0x86   :  { %26 = vst.msk [vmem:[#allocation0] sm:$0x1] %vm25_vm3, %v24_v6  }
  0x8d   :  { %v29_v8 = vld [vmem:[#allocation0] sm:$0x1] }
  0x8e   :  { %32 = vst [vmem:[%s56_s1] sm:$0x1] %v29_v8 }

// kernel: stem_layer.1
= control target key start
LH: loop header
LB: loop body
LE: loop exit
PB: predicated region body
PF: predicated region fallthrough
CT: control target
= control target key end

     0   :  { %s986_s18 = smov 0   ;;  %s1100_s0 = inlined_call_operand.vmem [shape: bf16[32,144], index: 0, kind: input, shape index: {}]   ;;  %s1101_s1 = inlined_call_operand.vmem [shape: bf16[144,128], index: 1, kind: input, shape index: {}]   ;;  %s1102_s2 = inlined_call_operand.vmem [shape: bf16[128,128], index: 2, kind: input, shape index: {}]   ;;  %s1103_s3 = inlined_call_operand.vmem [shape: bf16[128,128], index: 3, kind: input, shape index: {}]   ;;  %s1104_s4 = inlined_call_operand.vmem [shape: f32[6,128], index: 4, kind: input, shape index: {}]   ;;  %s1105_s5 = inlined_call_operand.vmem [shape: bf16[32,128], index: 5, kind: output, shape index: {}]  }
   0x1 LB: > { %s770_s19 = sadd.s32 4294967295, %s954_s18   ;;  %p774_p0 = scmp.ge.s32.totalorder %s954_s18, 1  ;;  %s954_s18 = sphi %s986_s18, %s15_s18  }
   0x2   : > { %p189_p1 = scmp.lt.s32.totalorder %s954_s18, 3 }
   0x4   : > { %p190_p2 = pnand %p774_p0, %p189_p1 }
   0x5   : > { %s775_s22 = sshll.u32 (!%p190_p2), %s770_s19, 1 }
   0x6   : > { %193 = sbr.rel (%p190_p2) target bundleno = 1021 (0x3fd), region = 40  ;;  %p219_p3 = scmp.lt.s32.totalorder (!%p190_p2), %s775_s22, 3 }
   0xb   : > { %v909_v0 = vld [vmem:[%s1101_s1 + $0x38] sm:$0xff]  ;;  %v908_v1 = vld [vmem:[%s1101_s1 + $0x30] sm:$0xff]  ;;  %v910_v2 = vld [vmem:[%s1101_s1 + $0x40] sm:$0xff]  ;;  %s1107_s22 = smov (!%p219_p3, %s775_s22), 3  ;;  %vm333_vm0 = vcmask 130048  }
   0xc   : > { %337 = vmatpush.bf16.msra.mxu0 %v909_v0  ;;  %v899_v3 = vld [vmem:[%s1103_s3 + $0x38] sm:$0xff]  ;;  %358 = vmatpush.bf16.msra.mxu1 %v910_v2  ;;  %s891_s29 = sshll.u32 %s1107_s22, 3  ;;  %v898_v4 = vld [vmem:[%s1103_s3 + $0x30] sm:$0xff]  ;;  %v907_v5 = vld [vmem:[%s1101_s1 + $0x28] sm:$0xff]  ;;  %s779_s16 = sshll.u32 %s1107_s22, 2 }
   0xd   : > { %414 = vmatpush.bf16.msra.mxu2 %v899_v3  ;;  %437 = vmatpush.bf16.msra.mxu3 %v899_v3  ;;  %s223_s11 = scalar_lea.vmem %s1100_s0, %s891_s29  ;;  %v897_v9 = vld [vmem:[%s1103_s3 + $0x28] sm:$0xff]  ;;  %v906_v10 = vld [vmem:[%s1101_s1 + $0x20] sm:$0xff]  ;;  %v905_v11 = vld [vmem:[%s1101_s1 + $0x18] sm:$0xff]  ;;  %s229_s20 = scalar_lea.vmem %s1105_s5, %s779_s16 }
   0xe   : > { %v900_v6 = vld [vmem:[%s223_s11 + $0x4] sm:$0xf]  ;;  %v784_v7 = vld [vmem:[%s223_s11 + $0x8] sm:$0xf0]  ;;  %v904_v12 = vld [vmem:[%s1101_s1 + $0x10] sm:$0xff] }
   0xf   : > { %v787_v8 = vor.u32 %v900_v6, %v784_v7  ;;  %v903_v13 = vld [vmem:[%s1101_s1 + $0x8] sm:$0xff]  ;;  %v902_v14 = vld [vmem:[%s1101_s1] sm:$0xff]  ;;  %v895_v19 = vld [vmem:[%s1103_s3 + $0x18] sm:$0xff] }
  0x10   : > { %338 = vmatpush.bf16.msra.mxu0 %v908_v1  ;;  %v782_v15 = vld [vmem:[%s223_s11] sm:$0xf]  ;;  %v901_v16 = vld [vmem:[%s223_s11 + $0x4] sm:$0xf0]  ;;  %v894_v20 = vld [vmem:[%s1103_s3 + $0x10] sm:$0xff] }
  0x11   : > { %415 = vmatpush.bf16.msra.mxu2 %v898_v4  ;;  %438 = vmatpush.bf16.msra.mxu3 %v898_v4  ;;  %v783_v17 = vor.u32 %v901_v16, %v782_v15  ;;  %v896_v18 = vld [vmem:[%s1103_s3 + $0x20] sm:$0xff]  ;;  %v893_v21 = vld [vmem:[%s1103_s3 + $0x8] sm:$0xff]  ;;  %v918_v51 = vld [vmem:[%s1102_s2 + $0x38] sm:$0xff] }
  0x12   : > { %824 = vmatmul.msk.bf16.vlgmr.msra.gmra.mxu1 %vm333_vm0, %v787_v8  ;;  %v892_v22 = vld [vmem:[%s1103_s3] sm:$0xff]  ;;  %v917_v54 = vld [vmem:[%s1102_s2 + $0x30] sm:$0xff]  ;;  %v916_v61 = vld [vmem:[%s1102_s2 + $0x28] sm:$0xff] }
  0x13   : > { %v932_v25 = vld [vmem:[%s1104_s4] ss:$0 sm:$0xff]  ;;  %v483_v53 = vld [vmem:[%s1104_s4 + $0x2] sm:$0x1]  ;;  %615 = vmatpush.bf16.msrb.mxu1 %v918_v51  ;;  %v933_v57 = vld [vmem:[%s1104_s4 + $0x1] ss:$0 sm:$0xff] }
  0x14   : > { %339 = vmatpush.bf16.msra.mxu0 %v907_v5  ;;  %v484_v58 = vpack.c.bf16 %v483_v53, %v483_v53 }
  0x15   : > { %416 = vmatpush.bf16.msra.mxu2 %v897_v9  ;;  %439 = vmatpush.bf16.msra.mxu3 %v897_v9 }
  0x16   : > { %v486_v1 = vpack.i.b16 %v484_v58, %v484_v58 }
  0x17   : > { %616 = vmatpush.bf16.msrb.mxu1 %v917_v54 }
  0x18   : > { %340 = vmatpush.bf16.msra.mxu0 %v906_v10  ;;  %v488_v7 = vperm.slane %v486_v1, 0  ;;  %v914_v10 = vld [vmem:[%s1102_s2 + $0x18] sm:$0xff] }
  0x19   : > { %417 = vmatpush.bf16.msra.mxu2 %v896_v18  ;;  %440 = vmatpush.bf16.msra.mxu3 %v896_v18 }
  0x1b   : > { %617 = vmatpush.bf16.msrb.mxu1 %v916_v61 }
  0x1c   : > { %341 = vmatpush.bf16.msra.mxu0 %v905_v11 }
  0x1d   : > { %418 = vmatpush.bf16.msra.mxu2 %v895_v19  ;;  %441 = vmatpush.bf16.msra.mxu3 %v895_v19 }
  0x20   : > { %342 = vmatpush.bf16.msra.mxu0 %v904_v12 }
  0x21   : > { %419 = vmatpush.bf16.msra.mxu2 %v894_v20  ;;  %442 = vmatpush.bf16.msra.mxu3 %v894_v20 }
  0x24   : > { %343 = vmatpush.bf16.msra.mxu0 %v903_v13  ;;  %v491_v13 = vunpack.c.l.bf16 %v488_v7 }
  0x25   : > { %420 = vmatpush.bf16.msra.mxu2 %v893_v21  ;;  %443 = vmatpush.bf16.msra.mxu3 %v893_v21 }
  0x28   : > { %344 = vmatpush.bf16.msra.mxu0 %v902_v14 }
  0x29   : > { %421 = vmatpush.bf16.msra.mxu2 %v892_v22  ;;  %444 = vmatpush.bf16.msra.mxu3 %v892_v22 }
  0x2b   : > { %345 = vmatmul.bf16.vlgmr.msra.gmra.mxu0 %v783_v17  ;;  %v913_v17 = vld [vmem:[%s1102_s2 + $0x10] sm:$0xff] }
  0x2c   : > { %630 = vmatpush.bf16.msrb.mxu0 %v899_v3 }
  0x2d   : > { %653 = vmatpush.bf16.msrb.mxu2 %v899_v3 }
  0x30   : > { %631 = vmatpush.bf16.msrb.mxu0 %v898_v4 }
  0x31   : > { %654 = vmatpush.bf16.msrb.mxu2 %v898_v4  ;;  %v915_v4 = vld [vmem:[%s1102_s2 + $0x20] sm:$0xff] }
  0x32   : > { %618 = vmatpush.bf16.msrb.mxu1 %v915_v4 }
  0x34   : > { %632 = vmatpush.bf16.msrb.mxu0 %v897_v9 }
  0x35   : > { %655 = vmatpush.bf16.msrb.mxu2 %v897_v9 }
  0x36   : > { %619 = vmatpush.bf16.msrb.mxu1 %v914_v10 }
  0x38   : > { %633 = vmatpush.bf16.msrb.mxu0 %v896_v18 }
  0x39   : > { %656 = vmatpush.bf16.msrb.mxu2 %v896_v18 }
  0x3a   : > { %620 = vmatpush.bf16.msrb.mxu1 %v913_v17 }
  0x3c   : > { %634 = vmatpush.bf16.msrb.mxu0 %v895_v19 }
  0x3d   : > { %657 = vmatpush.bf16.msrb.mxu2 %v895_v19 }
  0x40   : > { %635 = vmatpush.bf16.msrb.mxu0 %v894_v20 }
  0x41   : > { %658 = vmatpush.bf16.msrb.mxu2 %v894_v20 }
  0x44   : > { %636 = vmatpush.bf16.msrb.mxu0 %v893_v21 }
  0x45   : > { %659 = vmatpush.bf16.msrb.mxu2 %v893_v21 }
  0x48   : > { %637 = vmatpush.bf16.msrb.mxu0 %v892_v22 }
  0x49   : > { %660 = vmatpush.bf16.msrb.mxu2 %v892_v22  ;;  %v912_v22 = vld [vmem:[%s1102_s2 + $0x8] sm:$0xff] }
  0x4a   : > { %621 = vmatpush.bf16.msrb.mxu1 %v912_v22 }
  0x8f   : > { %v360_v23 = vpop.f32.mrf.mxu1 }
  0x97   : > { %v362_v29 = vpop.f32.mrf.mxu1 }
  0xa8   : > { %v346_v24 = vpop.f32.mrf.mxu0 }
  0xa9   : > { %v347_v26 = vadd.f32 %v932_v25, %v346_v24 }
  0xab   : > { %v361_v30 = vadd.f32 %v360_v23, %v347_v26  ;;  %v911_v26 = vld [vmem:[%s1102_s2] sm:$0xff] }
  0xac   : > { %622 = vmatpush.bf16.msrb.mxu1 %v911_v26 }
  0xb0   : > { %v348_v27 = vpop.f32.mrf.mxu0 }
  0xb1   : > { %v349_v28 = vadd.f32 %v932_v25, %v348_v27 }
  0xb3   : > { %v363_v31 = vadd.f32 %v362_v29, %v349_v28 }
  0xb5   : > { %v365_v32 = vpack.c.bf16 %v363_v31, %v361_v30 }
  0xb7   : > { %422 = vmatmul.bf16.vlgmr.msra.gmra.mxu2 %v365_v32 }
 0x13a   : > { %v423_v33 = vpop.f32.mrf.mxu2 }
 0x13b   : > { %v428_v34 = vsub.f32 %v361_v30, %v423_v33 }
 0x13d   : > { %v430_v35 = vpack.c.bf16 %v428_v34, %v428_v34 }
 0x13f   : > { %v432_v38 = vunpack.c.l.bf16 %v430_v35 }
 0x141   : > { %v434_v41 = vmul.f32 %v432_v38, %v432_v38 }
 0x142   : > { %v425_v36 = vpop.f32.mrf.mxu2 }
 0x143   : > { %v429_v37 = vsub.f32 %v363_v31, %v425_v36 }
 0x145   : > { %v431_v39 = vpack.c.bf16 %v429_v37, %v429_v37 }
 0x147   : > { %v433_v40 = vunpack.c.l.bf16 %v431_v39 }
 0x149   : > { %v435_v42 = vmul.f32 %v433_v40, %v433_v40 }
 0x14b   : > { %v436_v43 = vpack.c.bf16 %v435_v42, %v434_v41 }
 0x14d   : > { %445 = vmatmul.bf16.vlgmr.msra.gmra.mxu3 %v436_v43 }
 0x1d0   : > { %v446_v44 = vpop.f32.mrf.mxu3 }
 0x1d1   : > { %v447_v45 = vadd.f32 1e-06, %v446_v44 }
 0x1d3   : > { %936 = vrsqrt.f32 %v447_v45  ;;  %vm457_vm2 = vweird.f32 %v447_v45 }
 0x1d8   : > { %v448_v46 = vpop.f32.mrf.mxu3 }
 0x1d9   : > { %v937_v47 = vpop.eup %936  ;;  %v449_v48 = vadd.f32 1e-06, %v448_v46 }
 0x1da   : > { %v452_v49 = vmul.f32 %v937_v47, %v447_v45  ;;  %vm458_vm1 = vweird.f32 %v937_v47 }
 0x1db   : > { %938 = vrsqrt.f32 %v449_v48  ;;  %vm459_vm3 = vmor %vm457_vm2, %vm458_vm1  ;;  %vm467_vm5 = vweird.f32 %v449_v48 }
 0x1dc   : > { %v453_v50 = vmul.f32 %v937_v47, %v452_v49 }
 0x1de   : > { %v454_v52 = vmul.f32 0.5, %v453_v50 }
 0x1e0   : > { %v455_v55 = vsub.f32 1.5, %v454_v52 }
 0x1e1   : > { %v939_v56 = vpop.eup %938 }
 0x1e2   : > { %v456_v59 = vmul.f32 %v937_v47, %v455_v55  ;;  %v462_v60 = vmul.f32 %v939_v56, %v449_v48  ;;  %vm468_vm4 = vweird.f32 %v939_v56 }
 0x1e3   : > { %vm469_vm6 = vmor %vm467_vm5, %vm468_vm4 }
 0x1e4   : > { %v460_v62 = vsel %vm459_vm3, %v937_v47, %v456_v59  ;;  %v463_v63 = vmul.f32 %v939_v56, %v462_v60 }
 0x1e5   : > { %v473_v0 = vmul.f32 %v933_v57, %v460_v62 }
 0x1e6   : > { %v464_v2 = vmul.f32 0.5, %v463_v63 }
 0x1e7   : > { %v475_v3 = vpack.c.bf16 %v473_v0, %v473_v0 }
 0x1e8   : > { %v465_v5 = vsub.f32 1.5, %v464_v2 }
 0x1e9   : > { %v477_v6 = vunpack.c.l.bf16 %v475_v3 }
 0x1ea   : > { %v466_v8 = vmul.f32 %v939_v56, %v465_v5 }
 0x1eb   : > { %v479_v9 = vmul.f32 %v477_v6, %v432_v38 }
 0x1ec   : > { %v470_v11 = vsel %vm469_vm6, %v939_v56, %v466_v8 }
 0x1ed   : > { %v481_v12 = vpack.c.bf16 %v479_v9, %v479_v9  ;;  %v474_v14 = vmul.f32 %v933_v57, %v470_v11 }
 0x1ef   : > { %v489_v15 = vunpack.c.l.bf16 %v481_v12  ;;  %v476_v16 = vpack.c.bf16 %v474_v14, %v474_v14 }
 0x1f1   : > { %v492_v18 = vadd.f32 %v491_v13, %v489_v15  ;;  %v478_v19 = vunpack.c.l.bf16 %v476_v16 }
 0x1f3   : > { %v494_v20 = vpack.c.bf16 %v492_v18, %v492_v18  ;;  %v480_v21 = vmul.f32 %v478_v19, %v433_v40  ;;  %v934_v18 = vld [vmem:[%s1104_s4 + $0x3] ss:$0 sm:$0xff] }
 0x1f5   : > { %v496_v23 = vunpack.c.l.bf16 %v494_v20  ;;  %v482_v24 = vpack.c.bf16 %v480_v21, %v480_v21 }
 0x1f7   : > { %v490_v25 = vunpack.c.l.bf16 %v482_v24  ;;  %v498_v27 = vmul.f32 %v496_v23, %v496_v23  ;;  %v520_v1 = vmul.f32 0.5, %v496_v23 }
 0x1f9   : > { %v493_v28 = vadd.f32 %v491_v13, %v490_v25  ;;  %v500_v29 = vpack.c.bf16 %v498_v27, %v498_v27  ;;  %v522_v6 = vpack.c.bf16 %v520_v1, %v520_v1 }
 0x1fb   : > { %v495_v30 = vpack.c.bf16 %v493_v28, %v493_v28  ;;  %v502_v31 = vunpack.c.l.bf16 %v500_v29  ;;  %v542_v11 = vunpack.c.l.bf16 %v522_v6 }
 0x1fd   : > { %v497_v32 = vunpack.c.l.bf16 %v495_v30  ;;  %v504_v33 = vmul.f32 %v502_v31, %v496_v23 }
 0x1ff   : > { %v499_v34 = vmul.f32 %v497_v32, %v497_v32  ;;  %v506_v35 = vpack.c.bf16 %v504_v33, %v504_v33  ;;  %v521_v2 = vmul.f32 0.5, %v497_v32 }
 0x201   : > { %v501_v36 = vpack.c.bf16 %v499_v34, %v499_v34  ;;  %v508_v37 = vunpack.c.l.bf16 %v506_v35  ;;  %v523_v7 = vpack.c.bf16 %v521_v2, %v521_v2 }
 0x203   : > { %v503_v38 = vunpack.c.l.bf16 %v501_v36  ;;  %v510_v39 = vmul.f32 0.044677734, %v508_v37  ;;  %v543_v12 = vunpack.c.l.bf16 %v523_v7 }
 0x205   : > { %v505_v40 = vmul.f32 %v503_v38, %v497_v32  ;;  %v512_v41 = vpack.c.bf16 %v510_v39, %v510_v39 }
 0x207   : > { %v507_v42 = vpack.c.bf16 %v505_v40, %v505_v40  ;;  %v514_v43 = vunpack.c.l.bf16 %v512_v41 }
 0x209   : > { %v509_v44 = vunpack.c.l.bf16 %v507_v42  ;;  %v516_v45 = vadd.f32 %v514_v43, %v496_v23 }
 0x20b   : > { %v511_v46 = vmul.f32 0.044677734, %v509_v44  ;;  %v518_v47 = vpack.c.bf16 %v516_v45, %v516_v45  ;;  %v935_v44 = vld [vmem:[%s1104_s4 + $0x4] ss:$0 sm:$0xff] }
 0x20d   : > { %v513_v48 = vpack.c.bf16 %v511_v46, %v511_v46  ;;  %v524_v49 = vunpack.c.l.bf16 %v518_v47 }
 0x20f   : > { %v515_v50 = vunpack.c.l.bf16 %v513_v48  ;;  %v526_v51 = vmul.f32 0.796875, %v524_v49 }
 0x211   : > { %v517_v52 = vadd.f32 %v515_v50, %v497_v32  ;;  %v528_v53 = vpack.c.bf16 %v526_v51, %v526_v51  ;;  %v699_v50 = vld [vmem:[%s1104_s4 + $0x5] sm:$0x1] }
 0x213   : > { %v519_v54 = vpack.c.bf16 %v517_v52, %v517_v52  ;;  %v530_v55 = vunpack.c.l.bf16 %v528_v53 }
 0x215   : > { %v525_v56 = vunpack.c.l.bf16 %v519_v54  ;;  %940 = vtanh.f32 %v530_v55  ;;  %v700_v55 = vpack.c.bf16 %v699_v50, %v699_v50 }
 0x217   : > { %v527_v57 = vmul.f32 0.796875, %v525_v56 }
 0x219   : > { %v529_v58 = vpack.c.bf16 %v527_v57, %v527_v57 }
 0x21b   : > { %v941_v59 = vpop.eup %940  ;;  %v531_v60 = vunpack.c.l.bf16 %v529_v58 }
 0x21c   : > { %v534_v61 = vpack.c.bf16 %v941_v59, %v941_v59  ;;  %v702_v59 = vpack.i.b16 %v700_v55, %v700_v55 }
 0x21d   : > { %942 = vtanh.f32 %v531_v60 }
 0x21e   : > { %v536_v62 = vunpack.c.l.bf16 %v534_v61 }
 0x220   : > { %v538_v63 = vadd.f32 1.0, %v536_v62 }
 0x222   : > { %v540_v5 = vpack.c.bf16 %v538_v63, %v538_v63  ;;  %v704_v63 = vperm.slane %v702_v59, 0 }
 0x223   : > { %v943_v0 = vpop.eup %942 }
 0x224   : > { %v535_v3 = vpack.c.bf16 %v943_v0, %v943_v0  ;;  %v544_v10 = vunpack.c.l.bf16 %v540_v5 }
 0x226   : > { %v537_v4 = vunpack.c.l.bf16 %v535_v3  ;;  %v546_v14 = vmul.f32 %v544_v10, %v542_v11  ;;  %v707_v3 = vunpack.c.l.bf16 %v704_v63 }
 0x228   : > { %v539_v8 = vadd.f32 1.0, %v537_v4 }
 0x22a   : > { %v541_v9 = vpack.c.bf16 %v539_v8, %v539_v8 }
 0x22c   : > { %v545_v13 = vunpack.c.l.bf16 %v541_v9 }
 0x22e   : > { %v547_v15 = vmul.f32 %v545_v13, %v543_v12 }
 0x230   : > { %v548_v16 = vpack.c.bf16 %v547_v15, %v546_v14 }
 0x232   : > { %623 = vmatmul.bf16.vlgmr.msrb.gmra.mxu1 %v548_v16 }
 0x2af   : > { %v624_v17 = vpop.f32.mrf.mxu1 }
 0x2b0   : > { %v625_v20 = vadd.f32 %v934_v18, %v624_v17 }
 0x2b7   : > { %v626_v19 = vpop.f32.mrf.mxu1 }
 0x2b8   : > { %v627_v21 = vadd.f32 %v934_v18, %v626_v19 }
 0x2ba   : > { %v629_v22 = vpack.c.bf16 %v627_v21, %v625_v20 }
 0x2bc   : > { %638 = vmatmul.bf16.vlgmr.msrb.gmra.mxu0 %v629_v22 }
 0x339   : > { %v639_v23 = vpop.f32.mrf.mxu0 }
 0x33a   : > { %v644_v24 = vsub.f32 %v625_v20, %v639_v23 }
 0x33c   : > { %v646_v25 = vpack.c.bf16 %v644_v24, %v644_v24 }
 0x33e   : > { %v648_v28 = vunpack.c.l.bf16 %v646_v25 }
 0x340   : > { %v650_v31 = vmul.f32 %v648_v28, %v648_v28 }
 0x341   : > { %v641_v26 = vpop.f32.mrf.mxu0 }
 0x342   : > { %v645_v27 = vsub.f32 %v627_v21, %v641_v26 }
 0x344   : > { %v647_v29 = vpack.c.bf16 %v645_v27, %v645_v27 }
 0x346   : > { %v649_v30 = vunpack.c.l.bf16 %v647_v29 }
 0x348   : > { %v651_v32 = vmul.f32 %v649_v30, %v649_v30 }
 0x34a   : > { %v652_v33 = vpack.c.bf16 %v651_v32, %v650_v31 }
 0x34c   : > { %661 = vmatmul.bf16.vlgmr.msrb.gmra.mxu2 %v652_v33 }
 0x3cf   : > { %v662_v34 = vpop.f32.mrf.mxu2 }
 0x3d0   : > { %v663_v35 = vadd.f32 1e-06, %v662_v34 }
 0x3d2   : > { %944 = vrsqrt.f32 %v663_v35  ;;  %vm673_vm8 = vweird.f32 %v663_v35 }
 0x3d7   : > { %v664_v36 = vpop.f32.mrf.mxu2 }
 0x3d8   : > { %v945_v37 = vpop.eup %944  ;;  %v665_v38 = vadd.f32 1e-06, %v664_v36 }
 0x3d9   : > { %v668_v39 = vmul.f32 %v945_v37, %v663_v35  ;;  %vm674_vm7 = vweird.f32 %v945_v37 }
 0x3da   : > { %946 = vrsqrt.f32 %v665_v38  ;;  %vm675_vm9 = vmor %vm673_vm8, %vm674_vm7  ;;  %vm683_vm11 = vweird.f32 %v665_v38 }
 0x3db   : > { %v669_v40 = vmul.f32 %v945_v37, %v668_v39 }
 0x3dd   : > { %v670_v41 = vmul.f32 0.5, %v669_v40 }
 0x3df   : > { %v671_v42 = vsub.f32 1.5, %v670_v41 }
 0x3e0   : > { %v947_v43 = vpop.eup %946 }
 0x3e1   : > { %v672_v45 = vmul.f32 %v945_v37, %v671_v42  ;;  %v678_v46 = vmul.f32 %v947_v43, %v665_v38  ;;  %vm684_vm10 = vweird.f32 %v947_v43 }
 0x3e2   : > { %vm685_vm12 = vmor %vm683_vm11, %vm684_vm10 }
 0x3e3   : > { %v676_v47 = vsel %vm675_vm9, %v945_v37, %v672_v45  ;;  %v679_v48 = vmul.f32 %v947_v43, %v678_v46 }
 0x3e4   : > { %v689_v49 = vmul.f32 %v935_v44, %v676_v47 }
 0x3e5   : > { %v680_v51 = vmul.f32 0.5, %v679_v48 }
 0x3e6   : > { %v691_v52 = vpack.c.bf16 %v689_v49, %v689_v49 }
 0x3e7   : > { %v681_v53 = vsub.f32 1.5, %v680_v51 }
 0x3e8   : > { %v693_v54 = vunpack.c.l.bf16 %v691_v52 }
 0x3e9   : > { %v682_v56 = vmul.f32 %v947_v43, %v681_v53 }
 0x3ea   : > { %v695_v58 = vmul.f32 %v693_v54, %v648_v28 }
 0x3eb   : > { %v686_v57 = vsel %vm685_vm12, %v947_v43, %v682_v56 }
 0x3ec   : > { %v690_v60 = vmul.f32 %v935_v44, %v686_v57  ;;  %v697_v62 = vpack.c.bf16 %v695_v58, %v695_v58 }
 0x3ee   : > { %v692_v61 = vpack.c.bf16 %v690_v60, %v690_v60  ;;  %v705_v2 = vunpack.c.l.bf16 %v697_v62 }
 0x3f0   : > { %v694_v0 = vunpack.c.l.bf16 %v692_v61  ;;  %v708_v6 = vadd.f32 %v707_v3, %v705_v2 }
 0x3f2   : > { %v696_v1 = vmul.f32 %v694_v0, %v649_v30 }
 0x3f4   : > { %v698_v4 = vpack.c.bf16 %v696_v1, %v696_v1 }
 0x3f6   : > { %v706_v5 = vunpack.c.l.bf16 %v698_v4 }
 0x3f8   : > { %v709_v7 = vadd.f32 %v707_v3, %v706_v5 }
 0x3fa   : > { %v922_v8 = vpack.c.bf16 %v709_v7, %v708_v6 }
 0x3fc   : > { %923 = vst [vmem:[%s229_s20] sm:$0xff] %v922_v8  }
 0x3fd PF: > { %s15_s18 = sadd.s32 1, %s954_s18  }
 0x3fe   : > { %p12_p4 = scmp.ge.s32.totalorder %s15_s18, 4  }
 0x400   :  { %14 = sbr.rel (!%p12_p4) target bundleno = 1 (0x1), region = 70 }

</bundles_post_ra>
